<compile_context>
chip_gen: v5e
topology: v5e:2x2
jax: 0.10.0
libtpu: 0.0.40
codegen_flags: <defaults>
</compile_context>

<pallas_src>
import functools

import jax
import jax.numpy as jnp
from jax import lax
from jax.experimental import pallas as pl
from jax.experimental.pallas import tpu as pltpu

# ----- synthetic config (mirrors Net.__init__ with a concrete tune_config) -----
INPUT_LEN = 16
HIDDEN_LAYERS = [32, 32]
OUTPUT_LEN = 8
ACTIVATIONS = ["relu", "relu", "sigmoid"]  # one per Linear layer (zip in __init__)

_LANE = 128      # TPU lane width; batch lives on the lane axis of every intermediate
_TILE = 16384    # per-grid-step DMA tile along batch (lanes): ~1 MiB x-in + 256 KiB out
_CHUNK = 512     # inner compute chunk (lanes): f32 (32, 512) intermediate = 16 vregs


def _apply_act(name, x):
    # mirrors get_activation(): relu / sigmoid / default relu
    if name == "relu":
        return jnp.maximum(x, 0.0)
    elif name == "sigmoid":
        return jax.nn.sigmoid(x)
    else:
        return jnp.maximum(x, 0.0)


def _round_up(n, m):
    return (n + m - 1) // m * m


def _choose_tiling(batch):
    """Pick (batch_tile, num_steps, inner_chunk); tiles are multiples of 128 lanes."""
    b_pad = _round_up(batch, _LANE)
    if b_pad <= _LANE:
        tile = b_pad                     # too small to split further
    else:
        # >= 2 grid steps so the "parallel" axis can shard across v7x's two TensorCores;
        # cap the tile so huge batches stream with bounded VMEM and stay pipelined.
        tile = min(_TILE, _round_up(pl.cdiv(b_pad, 2), _LANE))
    num_steps = pl.cdiv(batch, tile)
    chunk = next(c for c in (_CHUNK, 256, _LANE) if tile % c == 0)
    return tile, num_steps, chunk


def mlp_kernel(x_ref, w1_ref, b1_ref, w2_ref, b2_ref, w3_ref, b3_ref, o_ref,
               *, chunk, n_chunks, compute_dtype):
    """Fused 3-layer MLP on one batch tile, chunked along the lane (batch) axis.

    x_ref : (batch_tile, INPUT_LEN) f32   (batch on sublanes as stored in HBM)
    wN    : (out, in) compute dtype, bN : (out, 1) f32
    o_ref : (OUTPUT_LEN, batch_tile) out dtype  (batch on lanes -> lane-dense stores)
    """

    def body(c, carry):
        start = pl.multiple_of(c * chunk, chunk)
        xb = x_ref[pl.ds(start, chunk), :].astype(compute_dtype)       # (chunk, 16)
        # layer 1: contract the input-feature axis of both operands -> (H0, chunk);
        # this is W1 @ xb^T, done natively by the MXU (no host-side transpose of x).
        h = lax.dot_general(w1_ref[...], xb,
                            dimension_numbers=(((1,), (1,)), ((), ())),
                            preferred_element_type=jnp.float32)
        h = _apply_act(ACTIVATIONS[0], h + b1_ref[...])                # f32 epilogue
        h = jnp.dot(w2_ref[...], h.astype(compute_dtype),
                    preferred_element_type=jnp.float32)
        h = _apply_act(ACTIVATIONS[1], h + b2_ref[...])
        h = jnp.dot(w3_ref[...], h.astype(compute_dtype),
                    preferred_element_type=jnp.float32)
        h = _apply_act(ACTIVATIONS[2], h + b3_ref[...])
        o_ref[:, pl.ds(start, chunk)] = h.astype(o_ref.dtype)
        return carry

    lax.fori_loop(0, n_chunks, body, None, unroll=(n_chunks <= 4))


@functools.partial(jax.jit, static_argnames=("compute_dtype", "out_dtype"))
def net_forward(x, params, compute_dtype=jnp.bfloat16, out_dtype=jnp.bfloat16):
    """x: (B, INPUT_LEN) f32 -> (B, OUTPUT_LEN) (PyTorch nn.Linear convention).

    Output dtype defaults to bf16 (sigmoid range [0,1]); pass out_dtype=jnp.float32
    for strict parity with the PyTorch module.
    """
    (w1, b1), (w2, b2), (w3, b3) = params
    B = x.shape[0]

    batch_tile, num_steps, chunk = _choose_tiling(B)
    n_chunks = batch_tile // chunk
    # VMEM (worst case, tile=16384): x 2 x 1 MiB + out 2 x 256 KiB + weights < 8 KiB
    # -> well under every generation's scoped default; no vmem_limit needed.

    w1c = w1.astype(compute_dtype)
    w2c = w2.astype(compute_dtype)
    w3c = w3.astype(compute_dtype)

    def weight_spec(shape):
        # constant block index -> fetched once, stays VMEM-resident across the grid
        return pl.BlockSpec(shape, lambda i: (0, 0))

    kernel = functools.partial(mlp_kernel, chunk=chunk, n_chunks=n_chunks,
                               compute_dtype=compute_dtype)

    out_t = pl.pallas_call(
        kernel,
        out_shape=jax.ShapeDtypeStruct((OUTPUT_LEN, B), out_dtype),
        grid_spec=pl.GridSpec(
            grid=(num_steps,),
            in_specs=[
                pl.BlockSpec((batch_tile, INPUT_LEN), lambda i: (i, 0)),
                weight_spec(w1c.shape), weight_spec(b1.shape),
                weight_spec(w2c.shape), weight_spec(b2.shape),
                weight_spec(w3c.shape), weight_spec(b3.shape),
            ],
            out_specs=pl.BlockSpec((OUTPUT_LEN, batch_tile), lambda i: (0, i)),
        ),
        compiler_params=pltpu.CompilerParams(
            dimension_semantics=("parallel",),
        ),
    )(x, w1c, b1, w2c, b2, w3c, b3)

    # (OUTPUT_LEN, B) -> (B, OUTPUT_LEN) PyTorch layout.
    # TODO(synk): consumers that can accept the (OUTPUT_LEN, B) layout should skip this.
    return out_t.T


def init_params(key):
    """Matches nn.Linear init U(-1/sqrt(fan_in), 1/sqrt(fan_in)); W stored (out, in)."""
    dims = [INPUT_LEN] + HIDDEN_LAYERS + [OUTPUT_LEN]
    params = []
    for fan_in, fan_out in zip(dims[:-1], dims[1:]):
        key, kw, kb = jax.random.split(key, 3)
        bound = 1.0 / (fan_in ** 0.5)
        w = jax.random.uniform(kw, (fan_out, fan_in), jnp.float32, -bound, bound)
        b = jax.random.uniform(kb, (fan_out, 1), jnp.float32, -bound, bound)
        params.append((w, b))
    return params


def reference_forward(x, params):
    """Pure-JAX f32 reference identical to the PyTorch forward."""
    h = x
    for (w, b), act in zip(params, ACTIVATIONS):
        h = _apply_act(act, h @ w.T + b.T)
    return h


if __name__ == "__main__":
    key = jax.random.PRNGKey(0)
    k_param, k_x = jax.random.split(key)
    params = init_params(k_param)

    batch = 200  # not a multiple of 128: exercises the 2-step grid + clipped ragged block
    x = jax.random.normal(k_x, (batch, INPUT_LEN), jnp.float32)

    out = jax.block_until_ready(net_forward(x, params))
    ref = reference_forward(x, params)

    assert out.shape == (batch, OUTPUT_LEN)
    # bf16 matmul operands / bf16 output (f32 MXU accumulation) vs f32 reference
    assert jnp.allclose(out.astype(jnp.float32), ref, atol=2e-2, rtol=2e-2), \
        "mismatch vs JAX reference"

    print("KERNEL_OK")
</pallas_src>

<mosaic_0001>
module attributes {stable_mosaic.version = 11 : i64} {
  func.func @mlp_kernel(%arg0: i32, %arg1: memref<128x16xf32, #tpu.memory_space<vmem>>, %arg2: memref<32x16xbf16, #tpu.memory_space<vmem>>, %arg3: memref<32x1xf32, #tpu.memory_space<vmem>>, %arg4: memref<32x32xbf16, #tpu.memory_space<vmem>>, %arg5: memref<32x1xf32, #tpu.memory_space<vmem>>, %arg6: memref<8x32xbf16, #tpu.memory_space<vmem>>, %arg7: memref<8x1xf32, #tpu.memory_space<vmem>>, %arg8: memref<8x128xbf16, #tpu.memory_space<vmem>>) attributes {dimension_semantics = [#tpu.dimension_semantics<parallel>], iteration_bounds = array<i64: 2>, scalar_prefetch = 0 : i64, scratch_operands = 0 : i64, tpu.core_type = #tpu.core_type<tc>, window_params = [{transform_indices = @transform_0, window_bounds = array<i64: 128, 16>}, {pipeline_mode = #tpu.pipeline_mode<synchronous>, transform_indices = @transform_1, window_bounds = array<i64: 32, 16>}, {pipeline_mode = #tpu.pipeline_mode<synchronous>, transform_indices = @transform_2, window_bounds = array<i64: 32, 1>}, {pipeline_mode = #tpu.pipeline_mode<synchronous>, transform_indices = @transform_3, window_bounds = array<i64: 32, 32>}, {pipeline_mode = #tpu.pipeline_mode<synchronous>, transform_indices = @transform_4, window_bounds = array<i64: 32, 1>}, {pipeline_mode = #tpu.pipeline_mode<synchronous>, transform_indices = @transform_5, window_bounds = array<i64: 8, 32>}, {pipeline_mode = #tpu.pipeline_mode<synchronous>, transform_indices = @transform_6, window_bounds = array<i64: 8, 1>}, {transform_indices = @transform_7, window_bounds = array<i64: 8, 128>}]} {
    %c0_i32 = arith.constant 0 : i32
    %c128_i32 = arith.constant 128 : i32
    %0 = arith.muli %c0_i32, %c128_i32 : i32
    %1 = tpu.assume_multiple %0, 128 : i32
    %2 = arith.index_cast %1 : i32 to index
    %c0 = arith.constant 0 : index
    %3 = vector.load %arg1[%2, %c0] : memref<128x16xf32, #tpu.memory_space<vmem>>, vector<128x16xf32>
    %4 = arith.truncf %3 : vector<128x16xf32> to vector<128x16xbf16>
    %c0_0 = arith.constant 0 : index
    %c0_1 = arith.constant 0 : index
    %5 = vector.load %arg2[%c0_0, %c0_1] : memref<32x16xbf16, #tpu.memory_space<vmem>>, vector<32x16xbf16>
    %cst = arith.constant dense<0.000000e+00> : vector<32x128xf32>
    %6 = tpu.matmul %5, %4, %cst {dimension_numbers = #tpu.dot_dimension_numbers<[1], [1], [0], [0], [0, 0, 1, 0], [], []>} : vector<32x16xbf16>, vector<128x16xbf16>, vector<32x128xf32> -> vector<32x128xf32>
    %c0_2 = arith.constant 0 : index
    %c0_3 = arith.constant 0 : index
    %7 = vector.load %arg3[%c0_2, %c0_3] : memref<32x1xf32, #tpu.memory_space<vmem>>, vector<32x1xf32>
    %8 = vector.broadcast %7 : vector<32x1xf32> to vector<32x128xf32>
    %9 = arith.addf %6, %8 : vector<32x128xf32>
    %cst_4 = arith.constant 0.000000e+00 : f32
    %10 = vector.broadcast %cst_4 : f32 to vector<32x128xf32>
    %11 = arith.maximumf %9, %10 : vector<32x128xf32>
    %c0_5 = arith.constant 0 : index
    %c0_6 = arith.constant 0 : index
    %12 = vector.load %arg4[%c0_5, %c0_6] : memref<32x32xbf16, #tpu.memory_space<vmem>>, vector<32x32xbf16>
    %13 = arith.truncf %11 : vector<32x128xf32> to vector<32x128xbf16>
    %cst_7 = arith.constant dense<0.000000e+00> : vector<32x128xf32>
    %14 = tpu.matmul %12, %13, %cst_7 {dimension_numbers = #tpu.dot_dimension_numbers<[1], [0], [0], [1], [0, 0, 1, 1], [], []>} : vector<32x32xbf16>, vector<32x128xbf16>, vector<32x128xf32> -> vector<32x128xf32>
    %c0_8 = arith.constant 0 : index
    %c0_9 = arith.constant 0 : index
    %15 = vector.load %arg5[%c0_8, %c0_9] : memref<32x1xf32, #tpu.memory_space<vmem>>, vector<32x1xf32>
    %16 = vector.broadcast %15 : vector<32x1xf32> to vector<32x128xf32>
    %17 = arith.addf %14, %16 : vector<32x128xf32>
    %cst_10 = arith.constant 0.000000e+00 : f32
    %18 = vector.broadcast %cst_10 : f32 to vector<32x128xf32>
    %19 = arith.maximumf %17, %18 : vector<32x128xf32>
    %c0_11 = arith.constant 0 : index
    %c0_12 = arith.constant 0 : index
    %20 = vector.load %arg6[%c0_11, %c0_12] : memref<8x32xbf16, #tpu.memory_space<vmem>>, vector<8x32xbf16>
    %21 = arith.truncf %19 : vector<32x128xf32> to vector<32x128xbf16>
    %cst_13 = arith.constant dense<0.000000e+00> : vector<8x128xf32>
    %22 = tpu.matmul %20, %21, %cst_13 {dimension_numbers = #tpu.dot_dimension_numbers<[1], [0], [0], [1], [0, 0, 1, 1], [], []>} : vector<8x32xbf16>, vector<32x128xbf16>, vector<8x128xf32> -> vector<8x128xf32>
    %c0_14 = arith.constant 0 : index
    %c0_15 = arith.constant 0 : index
    %23 = vector.load %arg7[%c0_14, %c0_15] : memref<8x1xf32, #tpu.memory_space<vmem>>, vector<8x1xf32>
    %24 = vector.broadcast %23 : vector<8x1xf32> to vector<8x128xf32>
    %25 = arith.addf %22, %24 : vector<8x128xf32>
    %26 = arith.negf %25 : vector<8x128xf32>
    %27 = math.exp %26 : vector<8x128xf32>
    %cst_16 = arith.constant 1.000000e+00 : f32
    %28 = vector.broadcast %cst_16 : f32 to vector<8x128xf32>
    %29 = arith.addf %28, %27 : vector<8x128xf32>
    %30 = arith.divf %28, %29 : vector<8x128xf32>
    %31 = arith.truncf %30 : vector<8x128xf32> to vector<8x128xbf16>
    %c0_17 = arith.constant 0 : index
    %32 = arith.index_cast %1 : i32 to index
    %33 = vector.load %arg8[%c0_17, %32] : memref<8x128xbf16, #tpu.memory_space<vmem>>, vector<8x128xbf16>
    tpu.vector_store %arg8[%c0_17, %32], %31 {strides = array<i32>} : memref<8x128xbf16, #tpu.memory_space<vmem>>, vector<8x128xbf16>,
    %c1_i32 = arith.constant 1 : i32
    return
  }
  func.func @transform_0(%arg0: i32) -> (i32, i32) {
    %c0_i32 = arith.constant 0 : i32
    %c0_i32_0 = arith.constant 0 : i32
    return %arg0, %c0_i32 : i32, i32
  }
  func.func @transform_1(%arg0: i32) -> (i32, i32) {
    %c0_i32 = arith.constant 0 : i32
    %c0_i32_0 = arith.constant 0 : i32
    %c0_i32_1 = arith.constant 0 : i32
    return %c0_i32, %c0_i32_0 : i32, i32
  }
  func.func @transform_2(%arg0: i32) -> (i32, i32) {
    %c0_i32 = arith.constant 0 : i32
    %c0_i32_0 = arith.constant 0 : i32
    %c0_i32_1 = arith.constant 0 : i32
    return %c0_i32, %c0_i32_0 : i32, i32
  }
  func.func @transform_3(%arg0: i32) -> (i32, i32) {
    %c0_i32 = arith.constant 0 : i32
    %c0_i32_0 = arith.constant 0 : i32
    %c0_i32_1 = arith.constant 0 : i32
    return %c0_i32, %c0_i32_0 : i32, i32
  }
  func.func @transform_4(%arg0: i32) -> (i32, i32) {
    %c0_i32 = arith.constant 0 : i32
    %c0_i32_0 = arith.constant 0 : i32
    %c0_i32_1 = arith.constant 0 : i32
    return %c0_i32, %c0_i32_0 : i32, i32
  }
  func.func @transform_5(%arg0: i32) -> (i32, i32) {
    %c0_i32 = arith.constant 0 : i32
    %c0_i32_0 = arith.constant 0 : i32
    %c0_i32_1 = arith.constant 0 : i32
    return %c0_i32, %c0_i32_0 : i32, i32
  }
  func.func @transform_6(%arg0: i32) -> (i32, i32) {
    %c0_i32 = arith.constant 0 : i32
    %c0_i32_0 = arith.constant 0 : i32
    %c0_i32_1 = arith.constant 0 : i32
    return %c0_i32, %c0_i32_0 : i32, i32
  }
  func.func @transform_7(%arg0: i32) -> (i32, i32) {
    %c0_i32 = arith.constant 0 : i32
    %c0_i32_0 = arith.constant 0 : i32
    return %c0_i32, %arg0 : i32, i32
  }
}

</mosaic_0001>

<bundles_post_ra>
// kernel: net_forward.1
= control target key start
LH: loop header
LB: loop body
LE: loop exit
PB: predicated region body
PF: predicated region fallthrough
CT: control target
= control target key end

     0   :  { %12 = vsyncpa [#allocation3], 0  ;;  %s961_s0 = inlined_call_operand.vmem [shape: f32[200,16], index: 0, kind: input, shape index: {}]   ;;  %s962_s1 = inlined_call_operand.vmem [shape: bf16[32,16], index: 1, kind: input, shape index: {}]   ;;  %s963_s2 = inlined_call_operand.vmem [shape: f32[32,1], index: 2, kind: input, shape index: {}]   ;;  %s964_s3 = inlined_call_operand.vmem [shape: bf16[32,32], index: 3, kind: input, shape index: {}]   ;;  %s965_s4 = inlined_call_operand.vmem [shape: f32[32,1], index: 4, kind: input, shape index: {}]   ;;  %s966_s5 = inlined_call_operand.vmem [shape: bf16[8,32], index: 5, kind: input, shape index: {}]   ;;  %s967_s6 = inlined_call_operand.vmem [shape: f32[8,1], index: 6, kind: input, shape index: {}]   ;;  %s968_s7 = inlined_call_operand.hbm [shape: bf16[8,200], index: 7, kind: output, shape index: {}]  }
   0x1   :  { %14 = vsyncpa [#allocation3 + $0x1], 0  ;;  %s804_s24 = smov 0   ;;  %s806_s25 = smov 0  }
   0x2   :  { %s808_s26 = smov 0   ;;  %s810_s27 = smov 0  }
   0x3 LB: > { %s825_s28 = sadd.s32 4294967295, %s761_s27   ;;  %s607_s29 = sadd.s32 4294967294, %s761_s27   ;;  %s761_s27 = sphi %s810_s27, %s974_s27   ;;  %s757_s26 = sphi %s808_s26, %s973_s26   ;;  %s753_s25 = sphi %s806_s25, %s972_s25   ;;  %s749_s24 = sphi %s804_s24, %s971_s24  }
   0x4   : > { %s829_s30 = sadd.s32 1, %s761_s27   ;;  %s179_s8 = sadd.s32 1, %s757_s26 }
   0x5   : > { %s176_s9 = ssub.s32 %s761_s27, %s829_s30  ;;  %p189_p0 = scmp.ne.s32.totalorder %s757_s26, %s753_s25 }
   0x6   : > { %p177_p1 = scmp.eq.s32.totalorder %s176_s9, 0  ;;  %p190_p2 = scmp.eq.s32.totalorder %s825_s28, 1 }
   0x7   : > { %p195_p3 = scmp.ne.s32.totalorder %s753_s25, %s749_s24  ;;  %p196_p4 = scmp.eq.s32.totalorder %s607_s29, 1 }
   0x8   : > { %s840_s10 = scalar_select %p177_p1, %s757_s26, %s179_s8  }
   0x9   : > { %p842_p5 = por %p190_p2, %p189_p0  ;;  %p846_p6 = por %p196_p4, %p195_p3 }
   0xa   : > { %p610_p7 = scmp.ge.s32.totalorder %s761_s27, 1  ;;  %p249_p8 = scmp.lt.s32.totalorder %s761_s27, 3 }
   0xc   : > { %p250_p9 = pnand %p610_p7, %p249_p8 }
   0xd   : > { %s612_s13 = sshll.u32 (!%p250_p9), %s825_s28, 4  ;;  %s637_s20 = sshll.u32 (!%p250_p9), %s825_s28, 2 }
   0xe   : > { %253 = sbr.rel (%p250_p9) target bundleno = 572 (0x23c), region = 48  ;;  %p290_p10 = scmp.lt.s32.totalorder (!%p250_p9), %s612_s13, 24 }
   0xf   : > { %s543_s23 = scalar_lea.hbm (!%p250_p9), %s968_s7, %s637_s20  ;;  %s719_s18 = scalar_lea.hbm (!%p250_p9), %s968_s7, 8 }
  0x10   : > { %s547_s9 = sshll.u32 (!%p250_p9), %s543_s23, 4  ;;  %s548_s9 = int_to_ptr.hbm [resolvable:$true] %s547_s9 }
  0x13   : > { %s976_s13 = smov (!%p290_p10, %s612_s13), 24  ;;  %vm362_vm0 = vcmask 130048   ;;  %v763_v19 = vmov 0   ;;  %v330_v23 = vld [vmem:[%s963_s2 + $0x10] sm:$0xff]  ;;  %v328_v24 = vld [vmem:[%s963_s2] sm:$0xff]  ;;  %v331_v29 = vld [vmem:[%s963_s2 + $0x18] sm:$0xff] }
  0x14   : > { %s613_s14 = sshll.u32 %s976_s13, 3  ;;  %692 = vset.pattern.permute.xlu0 %v763_v19  ;;  %693 = vset.pattern.permute.xlu1 %v763_v19  ;;  %v329_v30 = vld [vmem:[%s963_s2 + $0x8] sm:$0xff]  ;;  %v422_v35 = vld [vmem:[%s965_s4] sm:$0xff]  ;;  %v424_v46 = vld [vmem:[%s965_s4 + $0x10] sm:$0xff]  ;;  %vm456_vm1 = vcmask 261120   ;;  %s713_s13 = sshra.s32 %s548_s9, 4  ;;  %s714_s13 = int_to_ptr.hbm [resolvable:$true] %s713_s13 }
  0x15   : > { %s856_s17 = scalar_lea.vmem %s961_s0, %s613_s14  ;;  %694 = vset.pattern.permute.xlu2 %v763_v19  ;;  %344 = vperm.xlu0 %692, %v330_v23   ;;  %v423_v36 = vld [vmem:[%s965_s4 + $0x8] sm:$0xff]  ;;  %v640_v40 = vld [vmem:[%s962_s1] sm:$0xff]  ;;  %v425_v56 = vld [vmem:[%s965_s4 + $0x18] sm:$0xff]  ;;  %s715_s14 = scalar_lea.hbm %s714_s13, 4 }
  0x16   : > { %v314_v0 = vld [vmem:[%s856_s17 + $0x70] sm:$0xff]  ;;  %v315_v1 = vld [vmem:[%s856_s17 + $0x78] sm:$0xff]  ;;  %v312_v3 = vld [vmem:[%s856_s17 + $0x60] sm:$0xff]  ;;  %334 = vperm.xlu1 %693, %v328_v24   ;;  %438 = vperm.xlu2 %694, %v424_v46   ;;  %p716_p11 = scmp.ne.s32.totalorder %s714_s13, %s715_s14  ;;  %p720_p0 = scmp.lt.s32.totalorder %s714_s13, %s968_s7 }
  0x17   : > { %v323_v2 = vpack.c.bf16 %v315_v1, %v314_v0  ;;  %v313_v4 = vld [vmem:[%s856_s17 + $0x68] sm:$0xff]  ;;  %v310_v8 = vld [vmem:[%s856_s17 + $0x50] sm:$0xff]  ;;  %v311_v9 = vld [vmem:[%s856_s17 + $0x58] sm:$0xff]  ;;  %p721_p1 = scmp.lt.s32.totalorder %s719_s18, %s715_s14 }
  0x18   : > { %v322_v6 = vpack.c.bf16 %v313_v4, %v312_v3  ;;  %v321_v10 = vpack.c.bf16 %v311_v9, %v310_v8  ;;  %v308_v12 = vld [vmem:[%s856_s17 + $0x40] sm:$0xff]  ;;  %v309_v13 = vld [vmem:[%s856_s17 + $0x48] sm:$0xff]  ;;  %v306_v16 = vld [vmem:[%s856_s17 + $0x30] sm:$0xff]  ;;  %p717_p12 = pnand %p716_p11, %p842_p5 }
  0x19   : > { %v391_v5 = vsel %vm362_vm0, %v323_v2, 0  ;;  %v320_v14 = vpack.c.bf16 %v309_v13, %v308_v12  ;;  %v307_v17 = vld [vmem:[%s856_s17 + $0x38] sm:$0xff]  ;;  %v304_v21 = vld [vmem:[%s856_s17 + $0x20] sm:$0xff]  ;;  %v305_v22 = vld [vmem:[%s856_s17 + $0x28] sm:$0xff]  ;;  %p722_p2 = por %p721_p1, %p720_p0 }
  0x1a   : > { %644 = vmatpush.bf16.xpose.msra.mxu3 %v391_v5  ;;  %393 = vmatpush.bf16.xpose.msra.mxu0 %v391_v5  ;;  %v388_v7 = vsel %vm362_vm0, %v322_v6, 0  ;;  %v385_v11 = vsel %vm362_vm0, %v321_v10, 0  ;;  %v319_v18 = vpack.c.bf16 %v307_v17, %v306_v16  ;;  %v318_v25 = vpack.c.bf16 %v305_v22, %v304_v21  ;;  %v302_v27 = vld [vmem:[%s856_s17 + $0x10] sm:$0xff]  ;;  %v303_v28 = vld [vmem:[%s856_s17 + $0x18] sm:$0xff]  ;;  %v300_v33 = vld [vmem:[%s856_s17] sm:$0xff]  ;;  %p718_p13 = pneg %p717_p12 }
  0x1b   : > { %v382_v15 = vsel %vm362_vm0, %v320_v14, 0  ;;  %v317_v31 = vpack.c.bf16 %v303_v28, %v302_v27  ;;  %v301_v34 = vld [vmem:[%s856_s17 + $0x8] sm:$0xff]  ;;  %v642_v61 = vld [vmem:[%s964_s3] sm:$0xff]  ;;  %s282_s17 = sand.u32 1, %s753_s25  }
  0x1c   : > { %v379_v20 = vsel %vm362_vm0, %v319_v18, 0  ;;  %v376_v26 = vsel %vm362_vm0, %v318_v25, 0  ;;  %v316_v37 = vpack.c.bf16 %v301_v34, %v300_v33  ;;  %v641_v39 = vld [vmem:[%s962_s1 + $0x8] sm:$0xff]  ;;  %v489_v62 = vld [vmem:[%s967_s6] sm:$0xff]  ;;  %s611_s19 = sshll.u32 %s282_s17, 2  ;;  %s533_s28 = scalar_lea.sflag [#allocation3], %s282_s17 }
  0x1d   : > { %349 = vperm.xlu0 %692, %v331_v29   ;;  %v373_v32 = vsel %vm362_vm0, %v317_v31, 0  ;;  %v643_v63 = vld [vmem:[%s964_s3 + $0x8] sm:$0xff]  ;;  %v486_v18 = vld [vmem:[%s966_s5] sm:$0xf]  ;;  %s284_s29 = scalar_lea.vmem [#allocation2], %s611_s19  ;;  %p723_p3 = pnand %p722_p2, %p718_p13 }
  0x1e   : > { %339 = vperm.xlu1 %693, %v329_v30   ;;  %v370_v38 = vsel %vm362_vm0, %v316_v37, 0  ;;  %443 = vperm.xlu2 %694, %v425_v56   ;;  %s545_s8 = sshll.u32 %s284_s29, 4  ;;  %s546_s8 = int_to_ptr.vmem [resolvable:$true] %s545_s8 }
  0x22   : > { %645 = vmatpush.bf16.xpose.msra.mxu3 %v388_v7  ;;  %394 = vmatpush.bf16.xpose.msra.mxu0 %v388_v7 }
  0x25   : > { %428 = vperm.xlu0 %692, %v422_v35  }
  0x26   : > { %433 = vperm.xlu1 %693, %v423_v36   ;;  %492 = vperm.xlu2 %694, %v489_v62  }
  0x2a   : > { %646 = vmatpush.bf16.xpose.msra.mxu3 %v385_v11  ;;  %395 = vmatpush.bf16.xpose.msra.mxu0 %v385_v11 }
  0x32   : > { %647 = vmatpush.bf16.xpose.msra.mxu3 %v382_v15  ;;  %396 = vmatpush.bf16.xpose.msra.mxu0 %v382_v15 }
  0x3a   : > { %648 = vmatpush.bf16.xpose.msra.mxu3 %v379_v20  ;;  %397 = vmatpush.bf16.xpose.msra.mxu0 %v379_v20 }
  0x42   : > { %649 = vmatpush.bf16.xpose.msra.mxu3 %v376_v26  ;;  %398 = vmatpush.bf16.xpose.msra.mxu0 %v376_v26 }
  0x4a   : > { %650 = vmatpush.bf16.xpose.msra.mxu3 %v373_v32  ;;  %399 = vmatpush.bf16.xpose.msra.mxu0 %v373_v32 }
  0x52   : > { %651 = vmatpush.bf16.xpose.msra.mxu3 %v370_v38  ;;  %400 = vmatpush.bf16.xpose.msra.mxu0 %v370_v38 }
  0x59   : > { %623 = vmatmul.msk.bf16.vlgmr.msra.gmra.mxu3 %vm362_vm0, %v641_v39  ;;  %622 = vmatmul.msk.bf16.vlgmr.msra.gmra.mxu0 %vm362_vm0, %v640_v40 }
  0x70   : > { %v439_v2 = vpop.permute.xlu2 %438 }
  0x78   : > { %v444_v6 = vpop.permute.xlu2 %443 }
  0x80   : > { %v493_v19 = vpop.permute.xlu2 %492 }
  0x87   : > { %v345_v42 = vpop.permute.xlu0 %344 }
  0x88   : > { %v335_v43 = vpop.permute.xlu1 %334 }
  0x8f   : > { %v350_v47 = vpop.permute.xlu0 %349 }
  0x90   : > { %v340_v49 = vpop.permute.xlu1 %339 }
  0x97   : > { %v429_v10 = vpop.permute.xlu0 %428 }
  0x98   : > { %v434_v4 = vpop.permute.xlu1 %433 }
  0xd6   : > { %v402_v41 = vpop.f32.mrf.mxu0 }
  0xd7   : > { %v403_v51 = vadd.f32 %v402_v41, %v335_v43 }
  0xd9   : > { %v412_v57 = vmax.f32 %v403_v51, 0.0 }
  0xdc   : > { %v407_v44 = vpop.f32.mrf.mxu3 }
  0xdd   : > { %v408_v48 = vadd.f32 %v407_v44, %v345_v42 }
  0xde   : > { %v404_v45 = vpop.f32.mrf.mxu0 }
  0xdf   : > { %v405_v52 = vadd.f32 %v404_v45, %v340_v49  ;;  %v414_v54 = vmax.f32 %v408_v48, 0.0 }
  0xe1   : > { %v413_v58 = vmax.f32 %v405_v52, 0.0 }
  0xe3   : > { %v420_v60 = vpack.c.bf16 %v413_v58, %v412_v57 }
  0xe4   : > { %v409_v50 = vpop.f32.mrf.mxu3 }
  0xe5   : > { %v410_v53 = vadd.f32 %v409_v50, %v350_v47 }
  0xe7   : > { %v415_v55 = vmax.f32 %v410_v53, 0.0 }
  0xe9   : > { %v421_v59 = vpack.c.bf16 %v415_v55, %v414_v54 }
  0xeb   : > { %469 = vmatpush.bf16.msra.mxu1 %v421_v59 }
  0xef   : > { %470 = vmatpush.bf16.msra.mxu1 %v420_v60 }
  0xf2   : > { %632 = vmatmul.msk.bf16.vlgmr.msra.gmra.mxu1 %vm456_vm1, %v642_v61 }
 0x102   : > { %633 = vmatmul.msk.bf16.gmra.mxu1 %vm456_vm1, %v643_v63 }
 0x16f   : > { %v472_v0 = vpop.f32.mrf.mxu1 }
 0x170   : > { %v473_v11 = vadd.f32 %v472_v0, %v429_v10 }
 0x172   : > { %v482_v16 = vmax.f32 %v473_v11, 0.0 }
 0x177   : > { %v474_v1 = vpop.f32.mrf.mxu1 }
 0x178   : > { %v475_v8 = vadd.f32 %v474_v1, %v434_v4 }
 0x17a   : > { %v483_v14 = vmax.f32 %v475_v8, 0.0 }
 0x17c   : > { %v487_v17 = vpack.c.bf16 %v483_v14, %v482_v16 }
 0x17f   : > { %v477_v3 = vpop.f32.mrf.mxu1 }
 0x180   : > { %v478_v5 = vadd.f32 %v477_v3, %v439_v2 }
 0x182   : > { %v484_v12 = vmax.f32 %v478_v5, 0.0 }
 0x187   : > { %v479_v7 = vpop.f32.mrf.mxu1 }
 0x188   : > { %v480_v9 = vadd.f32 %v479_v7, %v444_v6 }
 0x18a   : > { %v485_v13 = vmax.f32 %v480_v9, 0.0 }
 0x18c   : > { %v488_v15 = vpack.c.bf16 %v485_v13, %v484_v12 }
 0x18e   : > { %504 = vmatpush.bf16.msra.mxu2 %v488_v15 }
 0x192   : > { %505 = vmatpush.bf16.msra.mxu2 %v487_v17 }
 0x195   : > { %634 = vmatmul.msk.bf16.vlgmr.msra.gmra.mxu2 %vm456_vm1, %v486_v18 }
 0x218   : > { %v507_v20 = vpop.f32.mrf.mxu2 }
 0x219   : > { %v508_v21 = vadd.f32 %v507_v20, %v493_v19 }
 0x21b   : > { %v635_v22 = vmul.f32 -1.442695, %v508_v21 }
 0x21d   : > { %695 = vpow2.f32 %v635_v22 }
 0x220   : > { %v509_v23 = vpop.f32.mrf.mxu2 }
 0x223   : > { %v696_v24 = vpop.eup %695 }
 0x224   : > { %v514_v25 = vadd.f32 1.0, %v696_v24 }
 0x226   : > { %697 = vrcp.f32 %v514_v25  ;;  %v526_v29 = vand.u32 2147483648, %v514_v25  ;;  %v524_v31 = vand.u32 2147483647, %v514_v25  ;;  %vm520_vm3 = vweird.f32 %v514_v25 }
 0x228   : > { %v527_v33 = vor.u32 1.1754944e-38, %v526_v29  ;;  %vm525_vm5 = vcmp.eq.f32.partialorder %v524_v31, 8.507059e+37 }
 0x22c   : > { %v698_v26 = vpop.eup %697 }
 0x22d   : > { %v516_v27 = vmul.f32 %v698_v26, %v514_v25  ;;  %vm521_vm2 = vweird.f32 %v698_v26 }
 0x22e   : > { %vm522_vm4 = vmor %vm520_vm3, %vm521_vm2 }
 0x22f   : > { %v517_v28 = vsub.f32 1.0, %v516_v27 }
 0x231   : > { %v518_v30 = vmul.f32 %v698_v26, %v517_v28 }
 0x233   : > { %v519_v32 = vadd.f32 %v698_v26, %v518_v30 }
 0x235   : > { %v523_v34 = vsel %vm522_vm4, %v698_v26, %v519_v32 }
 0x236   : > { %v528_v35 = vsel %vm525_vm5, %v527_v33, %v523_v34 }
 0x237   : > { %v530_v36 = vpack.c.bf16 %v528_v35, %v528_v35 }
 0x239   : > { %531 = vst [vmem:[%s284_s29] sm:$0xf] %v530_v36 }
 0x23a   : > { %726 = shalt.err (!%p723_p3)
}
 0x23b   : > { %652 = dma.vmem_to_hbm [thread:$0]  (%p842_p5), %s546_s8, 64, %s548_s9, %s533_s28  }
 0x23c PF: > { %p658_p4 = scmp.ge.s32.totalorder %s761_s27, 2  ;;  %s559_s17 = sand.u32 1, %s749_s24  }
 0x23d   : > { %s560_s21 = scalar_lea.sflag [#allocation3], %s559_s17 }
 0x23e   : > { %p655_p7 = pnand %p658_p4, %p846_p6 }
 0x240   : > { %p656_p8 = pneg %p655_p7 }
 0x242   : > { %744 = dma.done.wait (%p656_p8), %s560_s21, 64  }
 0x243   : > { %746 = vsyncadd (%p656_p8), %s560_s21, 4294967232  ;;  %p17_p9 = scmp.ge.s32.totalorder %s829_s30, 4   ;;  %s971_s24 = smov %s753_s25 }
 0x244   : > { %s972_s25 = smov %s757_s26  ;;  %s973_s26 = smov %s840_s10 }
 0x245   : > { %s974_s27 = smov %s829_s30  ;;  %19 = sbr.rel (!%p17_p9) target bundleno = 3 (0x3), region = 83 }
 0x24a   :  { %566 = vsyncpa [#allocation3], 1 }
 0x24b   :  { %568 = vsyncpa [#allocation3 + $0x1], 1 }

</bundles_post_ra>
